<compile_context>
chip_gen: v5e
topology: v5e:2x2
jax: 0.10.0
libtpu: 0.0.40
codegen_flags: <defaults>
</compile_context>

<pallas_src>
import functools
import math

import jax
import jax.numpy as jnp
import numpy as np
from jax import lax
from jax.experimental import pallas as pl
from jax.experimental.pallas import tpu as pltpu


def _silu(x):
    # x * sigmoid(x).  exp() and the approximate reciprocal both run on the
    # EUP slot, keeping the divide off the (binding) VPU slot.
    return x * pl.reciprocal(1.0 + jnp.exp(-x), approx=True)


# ----------------------------------------------------------------------------
# Pallas kernel: whole fused block for one batch element.
# ----------------------------------------------------------------------------
def msblock_kernel(x_ref, w1_ref, b1_ref, wd_ref, b2_ref, w3_ref, b3_ref,
                   o_ref, hpad_ref, *, H, W, K):
    """Fused cv1(1x1) -> cv2(KxK depthwise) -> cv3(1x1) for one image.

    Layout: channels on sublanes, flattened H*W on lanes (lane-dense).
      x_ref    : (1, C1, HW)     activations (bf16 in HBM, f32 compute)
      w1_ref   : (Cm, C1)        cv1 weight (BN folded),    b1_ref: (Cm, 1)
      wd_ref   : (Cm, K*K)       depthwise weight (folded), b2_ref: (Cm, 1)
      w3_ref   : (Co, Cm)        cv3 weight (BN folded),    b3_ref: (Co, 1)
      o_ref    : (1, Co, HW)     output
      hpad_ref : (Cm, HW + 2*M)  flat zero-margined scratch for the taps
    """
    HW = H * W
    P = K // 2
    M = (hpad_ref.shape[1] - HW) // 2          # lane margin (>= P*W + P)
    C1 = w1_ref.shape[1]
    Cm = w1_ref.shape[0]
    Co = w3_ref.shape[0]

    x = x_ref[0].astype(jnp.float32)           # (C1, HW); all math in f32

    # ------------------ cv1: 1x1 conv (+folded BN) + SiLU -------------------
    w1 = w1_ref[...]
    if C1 >= 32:
        # wide-channel configs: contraction is big enough to feed the MXU
        h = jnp.dot(w1, x, preferred_element_type=jnp.float32) + b1_ref[...]
    else:
        # tiny contraction (C1 = 4): unrolled VPU FMAs beat a 4-wide MXU call
        h = jnp.broadcast_to(b1_ref[...], (Cm, HW))
        for ci in range(C1):
            h = h + w1[:, ci:ci + 1] * x[ci:ci + 1, :]
    h = _silu(h)                               # (Cm, HW)

    # ------------- cv2: KxK depthwise conv (+folded BN) + SiLU --------------
    # Write h once into a flat scratch with zero lane margins.  Every tap is a
    # static lane-shifted slice; rows that fall outside the image land in the
    # zero margins, so only the column wrap needs masking, and that mask is
    # folded into the hoisted, pre-broadcast per-tap weights.
    zeros_margin = jnp.zeros((Cm, M), jnp.float32)
    hpad_ref[:, 0:M] = zeros_margin
    hpad_ref[:, M + HW:M + HW + M] = zeros_margin
    hpad_ref[:, M:M + HW] = h

    col = lax.broadcasted_iota(jnp.int32, (1, HW), 1) % W
    wdm = wd_ref[...]                          # (Cm, K*K)
    wplanes = []                               # hoisted: one broadcast per tap
    for i in range(K):
        for j in range(K):
            dc = j - P
            wp = jnp.broadcast_to(wdm[:, i * K + j:i * K + j + 1], (Cm, HW))
            if dc < 0:                         # mask left column wrap
                wp = wp * (col >= -dc).astype(jnp.float32)
            elif dc > 0:                       # mask right column wrap
                wp = wp * (col < W - dc).astype(jnp.float32)
            wplanes.append(wp)

    hp = hpad_ref[...]                         # (Cm, HW + 2*M), one full load
    acc = jnp.broadcast_to(b2_ref[...], (Cm, HW))
    for t in range(K * K):                     # statically unrolled taps
        off = (t // K - P) * W + (t % K - P)
        acc = acc + hp[:, M + off:M + off + HW] * wplanes[t]
    h2 = _silu(acc)                            # (Cm, HW)

    # ------------------ cv3: 1x1 conv (+folded BN) + SiLU -------------------
    w3 = w3_ref[...]
    if Cm >= 32:
        y = jnp.dot(w3, h2, preferred_element_type=jnp.float32) + b3_ref[...]
    else:
        y = jnp.broadcast_to(b3_ref[...], (Co, HW))
        for c in range(Cm):
            y = y + w3[:, c:c + 1] * h2[c:c + 1, :]
    y = _silu(y)
    o_ref[0] = y.astype(o_ref.dtype)           # lane-dense (HW-wide) store


# ----------------------------------------------------------------------------
# Wrapper: NCHW in / NCHW out, (C, H*W) inside the kernel (free reshapes only).
# ----------------------------------------------------------------------------
def msblock_forward(x_nchw, w1, b1, wd, bd, w3, b3):
    N, C1, H, W = x_nchw.shape
    Cm = w1.shape[0]
    Co = w3.shape[0]
    K = int(round(math.sqrt(wd.shape[1])))
    HW = H * W
    P = K // 2
    # flat lane margin for the depthwise taps, rounded up to a full lane tile
    M = ((P * (W + 1) + 127) // 128) * 128

    x = x_nchw.reshape(N, C1, HW)              # free reshape, stays NCHW

    kernel = functools.partial(msblock_kernel, H=H, W=W, K=K)
    out = pl.pallas_call(
        kernel,
        out_shape=jax.ShapeDtypeStruct((N, Co, HW), x_nchw.dtype),
        grid_spec=pltpu.PrefetchScalarGridSpec(
            num_scalar_prefetch=0,
            grid=(N,),
            in_specs=[
                pl.BlockSpec((1, C1, HW), lambda n: (n, 0, 0)),
                pl.BlockSpec((Cm, C1), lambda n: (0, 0)),
                pl.BlockSpec((Cm, 1), lambda n: (0, 0)),
                pl.BlockSpec((Cm, K * K), lambda n: (0, 0)),
                pl.BlockSpec((Cm, 1), lambda n: (0, 0)),
                pl.BlockSpec((Co, Cm), lambda n: (0, 0)),
                pl.BlockSpec((Co, 1), lambda n: (0, 0)),
            ],
            out_specs=pl.BlockSpec((1, Co, HW), lambda n: (n, 0, 0)),
            scratch_shapes=[pltpu.VMEM((Cm, HW + 2 * M), jnp.float32)],
        ),
        compiler_params=pltpu.CompilerParams(
            dimension_semantics=("parallel",),     # megacore / v7x 2-TC split
            vmem_limit_bytes=48 * 1024 * 1024,     # explicit budget (v7x-safe)
        ),
    )(x, w1, b1, wd, bd, w3, b3)
    return out.reshape(N, Co, H, W)


# ----------------------------------------------------------------------------
# Deterministic parameter init (PyTorch shapes) + BN folding (inference mode).
# ----------------------------------------------------------------------------
def init_params(key, c1, c2, k=3, eps=1e-3):
    c_ = int(c2 * 2)
    keys = jax.random.split(key, 15)

    def conv_w(kk, shape, fan_in):
        bound = 1.0 / np.sqrt(fan_in)
        return jax.random.uniform(kk, shape, jnp.float32, -bound, bound)

    # Conv weights (PyTorch layouts, bias=False inside Conv):
    w1_t = conv_w(keys[0], (c_, c1), c1)          # cv1: (c_, c1, 1, 1)
    wd_t = conv_w(keys[1], (c_, k, k), k * k)     # cv2 depthwise: (c_, 1, k, k)
    w3_t = conv_w(keys[2], (c2, c_), c_)          # cv3: (c2, c_, 1, 1)

    def bn_params(kg, kb, km, kv, c):
        gamma = jax.random.uniform(kg, (c,), jnp.float32, 0.5, 1.5)
        beta = 0.1 * jax.random.normal(kb, (c,), jnp.float32)
        mean = 0.1 * jax.random.normal(km, (c,), jnp.float32)
        var = jax.random.uniform(kv, (c,), jnp.float32, 0.5, 1.5)
        return gamma, beta, mean, var

    g1, be1, m1, v1 = bn_params(keys[3], keys[4], keys[5], keys[6], c_)
    g2, be2, m2, v2 = bn_params(keys[7], keys[8], keys[9], keys[10], c_)
    g3, be3, m3, v3 = bn_params(keys[11], keys[12], keys[13], keys[14], c2)

    def fold(gamma, beta, mean, var):
        scale = gamma / jnp.sqrt(var + eps)
        bias = beta - mean * scale
        return scale, bias

    s1, b1 = fold(g1, be1, m1, v1)
    s2, b2 = fold(g2, be2, m2, v2)
    s3, b3 = fold(g3, be3, m3, v3)

    # Kernel layouts: out-channels on sublanes, (tap) index on lanes.
    w1 = w1_t * s1[:, None]                              # (c_, c1)
    wd = (wd_t * s2[:, None, None]).reshape(c_, k * k)   # (c_, k*k)
    w3 = w3_t * s3[:, None]                              # (c2, c_)
    return (w1, b1.reshape(c_, 1), wd, b2.reshape(c_, 1),
            w3, b3.reshape(c2, 1))


# ----------------------------------------------------------------------------
# Pure NumPy (float64) reference for correctness checking.
# ----------------------------------------------------------------------------
def reference_numpy(x_nchw, w1, b1, wd, bd, w3, b3, k):
    def silu(v):
        return v / (1.0 + np.exp(-v))

    x = np.asarray(jnp.asarray(x_nchw, jnp.float32)).astype(np.float64)
    w1 = np.asarray(w1, np.float64)   # (Cm, C1)
    b1 = np.asarray(b1, np.float64)   # (Cm, 1)
    wd = np.asarray(wd, np.float64)   # (Cm, k*k)
    bd = np.asarray(bd, np.float64)   # (Cm, 1)
    w3 = np.asarray(w3, np.float64)   # (Co, Cm)
    b3 = np.asarray(b3, np.float64)   # (Co, 1)

    N, C1, H, W = x.shape
    Cm = w1.shape[0]
    Co = w3.shape[0]
    P = k // 2

    h = silu(np.einsum('mc,nchw->nmhw', w1, x) + b1.reshape(1, Cm, 1, 1))
    hp = np.zeros((N, Cm, H + 2 * P, W + 2 * P), np.float64)
    hp[:, :, P:P + H, P:P + W] = h
    acc = np.zeros((N, Cm, H, W), np.float64)
    for i in range(k):
        for j in range(k):
            acc += hp[:, :, i:i + H, j:j + W] * wd[:, i * k + j].reshape(1, Cm, 1, 1)
    h2 = silu(acc + bd.reshape(1, Cm, 1, 1))
    y = silu(np.einsum('om,nmhw->nohw', w3, h2) + b3.reshape(1, Co, 1, 1))
    return y  # NCHW


if __name__ == "__main__":
    c1, c2, k = 4, 4, 3          # c_ = 2 * c2 = 8
    N, H, W = 2, 16, 16          # H*W = 256 lanes -> lane-dense

    key = jax.random.PRNGKey(0)
    kx, kp = jax.random.split(key)
    # activations travel as bf16 (halves HBM traffic); params stay f32 (tiny)
    x = jax.random.normal(kx, (N, c1, H, W), jnp.float32).astype(jnp.bfloat16)
    params = init_params(kp, c1, c2, k)

    out = msblock_forward(x, *params)
    out = jax.block_until_ready(out)

    assert out.shape == (N, c2, H, W), out.shape
    ref = reference_numpy(x, *params, k=k)
    out_f = np.asarray(jnp.asarray(out, jnp.float32)).astype(np.float64)
    np.testing.assert_allclose(out_f, ref, rtol=2e-2, atol=2e-2)
    print("KERNEL_OK")
</pallas_src>

<mosaic_0001>
module attributes {stable_mosaic.version = 11 : i64} {
  func.func @msblock_kernel(%arg0: i32, %arg1: memref<1x4x256xbf16, #tpu.memory_space<vmem>>, %arg2: memref<8x4xf32, #tpu.memory_space<vmem>>, %arg3: memref<8x1xf32, #tpu.memory_space<vmem>>, %arg4: memref<8x9xf32, #tpu.memory_space<vmem>>, %arg5: memref<8x1xf32, #tpu.memory_space<vmem>>, %arg6: memref<4x8xf32, #tpu.memory_space<vmem>>, %arg7: memref<4x1xf32, #tpu.memory_space<vmem>>, %arg8: memref<1x4x256xbf16, #tpu.memory_space<vmem>>, %arg9: memref<8x512xf32, #tpu.memory_space<vmem>>) attributes {dimension_semantics = [#tpu.dimension_semantics<parallel>], iteration_bounds = array<i64: 2>, scalar_prefetch = 0 : i64, scratch_operands = 1 : i64, tpu.core_type = #tpu.core_type<tc>, window_params = [{transform_indices = @transform_0, window_bounds = array<i64: 1, 4, 256>}, {pipeline_mode = #tpu.pipeline_mode<synchronous>, transform_indices = @transform_1, window_bounds = array<i64: 8, 4>}, {pipeline_mode = #tpu.pipeline_mode<synchronous>, transform_indices = @transform_2, window_bounds = array<i64: 8, 1>}, {pipeline_mode = #tpu.pipeline_mode<synchronous>, transform_indices = @transform_3, window_bounds = array<i64: 8, 9>}, {pipeline_mode = #tpu.pipeline_mode<synchronous>, transform_indices = @transform_4, window_bounds = array<i64: 8, 1>}, {pipeline_mode = #tpu.pipeline_mode<synchronous>, transform_indices = @transform_5, window_bounds = array<i64: 4, 8>}, {pipeline_mode = #tpu.pipeline_mode<synchronous>, transform_indices = @transform_6, window_bounds = array<i64: 4, 1>}, {transform_indices = @transform_7, window_bounds = array<i64: 1, 4, 256>}]} {
    %c0 = arith.constant 0 : index
    %c0_0 = arith.constant 0 : index
    %c0_1 = arith.constant 0 : index
    %0 = vector.load %arg1[%c0, %c0_0, %c0_1] : memref<1x4x256xbf16, #tpu.memory_space<vmem>>, vector<1x4x256xbf16>
    %1 = vector.shape_cast %0 : vector<1x4x256xbf16> to vector<4x256xbf16>
    %2 = arith.extf %1 : vector<4x256xbf16> to vector<4x256xf32>
    %c0_2 = arith.constant 0 : index
    %c0_3 = arith.constant 0 : index
    %3 = vector.load %arg2[%c0_2, %c0_3] : memref<8x4xf32, #tpu.memory_space<vmem>>, vector<8x4xf32>
    %c0_4 = arith.constant 0 : index
    %c0_5 = arith.constant 0 : index
    %4 = vector.load %arg3[%c0_4, %c0_5] : memref<8x1xf32, #tpu.memory_space<vmem>>, vector<8x1xf32>
    %5 = vector.shape_cast %4 : vector<8x1xf32> to vector<8x1xf32>
    %6 = vector.broadcast %5 : vector<8x1xf32> to vector<8x256xf32>
    %7 = vector.extract_strided_slice %3 {offsets = [0, 0], sizes = [8, 1], strides = [1, 1]} : vector<8x4xf32> to vector<8x1xf32>
    %8 = vector.extract_strided_slice %2 {offsets = [0, 0], sizes = [1, 256], strides = [1, 1]} : vector<4x256xf32> to vector<1x256xf32>
    %9 = vector.broadcast %7 : vector<8x1xf32> to vector<8x256xf32>
    %10 = vector.broadcast %8 : vector<1x256xf32> to vector<8x256xf32>
    %11 = arith.mulf %9, %10 : vector<8x256xf32>
    %12 = arith.addf %6, %11 : vector<8x256xf32>
    %13 = vector.extract_strided_slice %3 {offsets = [0, 1], sizes = [8, 1], strides = [1, 1]} : vector<8x4xf32> to vector<8x1xf32>
    %14 = vector.extract_strided_slice %2 {offsets = [1, 0], sizes = [1, 256], strides = [1, 1]} : vector<4x256xf32> to vector<1x256xf32>
    %15 = vector.broadcast %13 : vector<8x1xf32> to vector<8x256xf32>
    %16 = vector.broadcast %14 : vector<1x256xf32> to vector<8x256xf32>
    %17 = arith.mulf %15, %16 : vector<8x256xf32>
    %18 = arith.addf %12, %17 : vector<8x256xf32>
    %19 = vector.extract_strided_slice %3 {offsets = [0, 2], sizes = [8, 1], strides = [1, 1]} : vector<8x4xf32> to vector<8x1xf32>
    %20 = vector.extract_strided_slice %2 {offsets = [2, 0], sizes = [1, 256], strides = [1, 1]} : vector<4x256xf32> to vector<1x256xf32>
    %21 = vector.broadcast %19 : vector<8x1xf32> to vector<8x256xf32>
    %22 = vector.broadcast %20 : vector<1x256xf32> to vector<8x256xf32>
    %23 = arith.mulf %21, %22 : vector<8x256xf32>
    %24 = arith.addf %18, %23 : vector<8x256xf32>
    %25 = vector.extract_strided_slice %3 {offsets = [0, 3], sizes = [8, 1], strides = [1, 1]} : vector<8x4xf32> to vector<8x1xf32>
    %26 = vector.extract_strided_slice %2 {offsets = [3, 0], sizes = [1, 256], strides = [1, 1]} : vector<4x256xf32> to vector<1x256xf32>
    %27 = vector.broadcast %25 : vector<8x1xf32> to vector<8x256xf32>
    %28 = vector.broadcast %26 : vector<1x256xf32> to vector<8x256xf32>
    %29 = arith.mulf %27, %28 : vector<8x256xf32>
    %30 = arith.addf %24, %29 : vector<8x256xf32>
    %cst = arith.constant 0.000000e+00 : f32
    %31 = vector.broadcast %cst : f32 to vector<8x256xf32>
    %32 = arith.subf %31, %30 : vector<8x256xf32>
    %33 = math.exp %32 : vector<8x256xf32>
    %cst_6 = arith.constant 1.000000e+00 : f32
    %34 = vector.broadcast %cst_6 : f32 to vector<8x256xf32>
    %35 = arith.addf %34, %33 : vector<8x256xf32>
    %36 = tpu.reciprocal %35 {approx = true} : vector<8x256xf32> -> vector<8x256xf32>
    %37 = arith.mulf %30, %36 : vector<8x256xf32>
    %cst_7 = arith.constant 0.000000e+00 : f32
    %38 = vector.broadcast %cst_7 : f32 to vector<8x128xf32>
    %c0_8 = arith.constant 0 : index
    %c0_9 = arith.constant 0 : index
    %39 = vector.load %arg9[%c0_8, %c0_9] : memref<8x512xf32, #tpu.memory_space<vmem>>, vector<8x128xf32>
    tpu.vector_store %arg9[%c0_8, %c0_9], %38 {strides = array<i32>} : memref<8x512xf32, #tpu.memory_space<vmem>>, vector<8x128xf32>,
    %c0_10 = arith.constant 0 : index
    %c384 = arith.constant 384 : index
    %40 = vector.load %arg9[%c0_10, %c384] : memref<8x512xf32, #tpu.memory_space<vmem>>, vector<8x128xf32>
    tpu.vector_store %arg9[%c0_10, %c384], %38 {strides = array<i32>} : memref<8x512xf32, #tpu.memory_space<vmem>>, vector<8x128xf32>,
    %c0_11 = arith.constant 0 : index
    %c128 = arith.constant 128 : index
    %41 = vector.load %arg9[%c0_11, %c128] : memref<8x512xf32, #tpu.memory_space<vmem>>, vector<8x256xf32>
    tpu.vector_store %arg9[%c0_11, %c128], %37 {strides = array<i32>} : memref<8x512xf32, #tpu.memory_space<vmem>>, vector<8x256xf32>,
    %42 = tpu.iota {dimensions = array<i32: 1>} : vector<1x256xi32>
    %c16_i32 = arith.constant 16 : i32
    %c0_i32 = arith.constant 0 : i32
    %43 = arith.cmpi eq, %c16_i32, %c0_i32 : i32
    %c1_i32 = arith.constant 1 : i32
    %44 = arith.select %43, %c1_i32, %c16_i32 : i32
    %45 = vector.broadcast %44 : i32 to vector<1x256xi32>
    %46 = arith.remsi %42, %45 : vector<1x256xi32>
    %c0_i32_12 = arith.constant 0 : i32
    %47 = vector.broadcast %c0_i32_12 : i32 to vector<1x256xi32>
    %48 = arith.cmpi ne, %46, %47 : vector<1x256xi32>
    %c0_i32_13 = arith.constant 0 : i32
    %49 = vector.broadcast %c0_i32_13 : i32 to vector<1x256xi32>
    %50 = arith.cmpi slt, %46, %49 : vector<1x256xi32>
    %c0_i32_14 = arith.constant 0 : i32
    %51 = arith.cmpi slt, %44, %c0_i32_14 : i32
    %52 = vector.broadcast %51 : i1 to vector<1x256xi1>
    %53 = vector.broadcast %52 : vector<1x256xi1> to vector<1x256xi1>
    %54 = arith.xori %50, %53 : vector<1x256xi1>
    %55 = arith.andi %54, %48 : vector<1x256xi1>
    %56 = vector.broadcast %44 : i32 to vector<1x256xi32>
    %57 = arith.addi %46, %56 : vector<1x256xi32>
    %58 = arith.select %55, %57, %46 : vector<1x256xi1>, vector<1x256xi32>
    %c0_15 = arith.constant 0 : index
    %c0_16 = arith.constant 0 : index
    %59 = vector.load %arg4[%c0_15, %c0_16] : memref<8x9xf32, #tpu.memory_space<vmem>>, vector<8x9xf32>
    %60 = vector.extract_strided_slice %59 {offsets = [0, 0], sizes = [8, 1], strides = [1, 1]} : vector<8x9xf32> to vector<8x1xf32>
    %61 = vector.shape_cast %60 : vector<8x1xf32> to vector<8x1xf32>
    %62 = vector.broadcast %61 : vector<8x1xf32> to vector<8x256xf32>
    %c1_i32_17 = arith.constant 1 : i32
    %63 = vector.broadcast %c1_i32_17 : i32 to vector<1x256xi32>
    %64 = arith.cmpi sge, %58, %63 : vector<1x256xi32>
    %65 = arith.extui %64 : vector<1x256xi1> to vector<1x256xi32>
    %66 = arith.sitofp %65 : vector<1x256xi32> to vector<1x256xf32>
    %67 = vector.broadcast %66 : vector<1x256xf32> to vector<8x256xf32>
    %68 = arith.mulf %62, %67 : vector<8x256xf32>
    %69 = vector.extract_strided_slice %59 {offsets = [0, 1], sizes = [8, 1], strides = [1, 1]} : vector<8x9xf32> to vector<8x1xf32>
    %70 = vector.shape_cast %69 : vector<8x1xf32> to vector<8x1xf32>
    %71 = vector.broadcast %70 : vector<8x1xf32> to vector<8x256xf32>
    %72 = vector.extract_strided_slice %59 {offsets = [0, 2], sizes = [8, 1], strides = [1, 1]} : vector<8x9xf32> to vector<8x1xf32>
    %73 = vector.shape_cast %72 : vector<8x1xf32> to vector<8x1xf32>
    %74 = vector.broadcast %73 : vector<8x1xf32> to vector<8x256xf32>
    %c15_i32 = arith.constant 15 : i32
    %75 = vector.broadcast %c15_i32 : i32 to vector<1x256xi32>
    %76 = arith.cmpi slt, %58, %75 : vector<1x256xi32>
    %77 = arith.extui %76 : vector<1x256xi1> to vector<1x256xi32>
    %78 = arith.sitofp %77 : vector<1x256xi32> to vector<1x256xf32>
    %79 = vector.broadcast %78 : vector<1x256xf32> to vector<8x256xf32>
    %80 = arith.mulf %74, %79 : vector<8x256xf32>
    %81 = vector.extract_strided_slice %59 {offsets = [0, 3], sizes = [8, 1], strides = [1, 1]} : vector<8x9xf32> to vector<8x1xf32>
    %82 = vector.shape_cast %81 : vector<8x1xf32> to vector<8x1xf32>
    %83 = vector.broadcast %82 : vector<8x1xf32> to vector<8x256xf32>
    %c1_i32_18 = arith.constant 1 : i32
    %84 = vector.broadcast %c1_i32_18 : i32 to vector<1x256xi32>
    %85 = arith.cmpi sge, %58, %84 : vector<1x256xi32>
    %86 = arith.extui %85 : vector<1x256xi1> to vector<1x256xi32>
    %87 = arith.sitofp %86 : vector<1x256xi32> to vector<1x256xf32>
    %88 = vector.broadcast %87 : vector<1x256xf32> to vector<8x256xf32>
    %89 = arith.mulf %83, %88 : vector<8x256xf32>
    %90 = vector.extract_strided_slice %59 {offsets = [0, 4], sizes = [8, 1], strides = [1, 1]} : vector<8x9xf32> to vector<8x1xf32>
    %91 = vector.shape_cast %90 : vector<8x1xf32> to vector<8x1xf32>
    %92 = vector.broadcast %91 : vector<8x1xf32> to vector<8x256xf32>
    %93 = vector.extract_strided_slice %59 {offsets = [0, 5], sizes = [8, 1], strides = [1, 1]} : vector<8x9xf32> to vector<8x1xf32>
    %94 = vector.shape_cast %93 : vector<8x1xf32> to vector<8x1xf32>
    %95 = vector.broadcast %94 : vector<8x1xf32> to vector<8x256xf32>
    %c15_i32_19 = arith.constant 15 : i32
    %96 = vector.broadcast %c15_i32_19 : i32 to vector<1x256xi32>
    %97 = arith.cmpi slt, %58, %96 : vector<1x256xi32>
    %98 = arith.extui %97 : vector<1x256xi1> to vector<1x256xi32>
    %99 = arith.sitofp %98 : vector<1x256xi32> to vector<1x256xf32>
    %100 = vector.broadcast %99 : vector<1x256xf32> to vector<8x256xf32>
    %101 = arith.mulf %95, %100 : vector<8x256xf32>
    %102 = vector.extract_strided_slice %59 {offsets = [0, 6], sizes = [8, 1], strides = [1, 1]} : vector<8x9xf32> to vector<8x1xf32>
    %103 = vector.shape_cast %102 : vector<8x1xf32> to vector<8x1xf32>
    %104 = vector.broadcast %103 : vector<8x1xf32> to vector<8x256xf32>
    %c1_i32_20 = arith.constant 1 : i32
    %105 = vector.broadcast %c1_i32_20 : i32 to vector<1x256xi32>
    %106 = arith.cmpi sge, %58, %105 : vector<1x256xi32>
    %107 = arith.extui %106 : vector<1x256xi1> to vector<1x256xi32>
    %108 = arith.sitofp %107 : vector<1x256xi32> to vector<1x256xf32>
    %109 = vector.broadcast %108 : vector<1x256xf32> to vector<8x256xf32>
    %110 = arith.mulf %104, %109 : vector<8x256xf32>
    %111 = vector.extract_strided_slice %59 {offsets = [0, 7], sizes = [8, 1], strides = [1, 1]} : vector<8x9xf32> to vector<8x1xf32>
    %112 = vector.shape_cast %111 : vector<8x1xf32> to vector<8x1xf32>
    %113 = vector.broadcast %112 : vector<8x1xf32> to vector<8x256xf32>
    %114 = vector.extract_strided_slice %59 {offsets = [0, 8], sizes = [8, 1], strides = [1, 1]} : vector<8x9xf32> to vector<8x1xf32>
    %115 = vector.shape_cast %114 : vector<8x1xf32> to vector<8x1xf32>
    %116 = vector.broadcast %115 : vector<8x1xf32> to vector<8x256xf32>
    %c15_i32_21 = arith.constant 15 : i32
    %117 = vector.broadcast %c15_i32_21 : i32 to vector<1x256xi32>
    %118 = arith.cmpi slt, %58, %117 : vector<1x256xi32>
    %119 = arith.extui %118 : vector<1x256xi1> to vector<1x256xi32>
    %120 = arith.sitofp %119 : vector<1x256xi32> to vector<1x256xf32>
    %121 = vector.broadcast %120 : vector<1x256xf32> to vector<8x256xf32>
    %122 = arith.mulf %116, %121 : vector<8x256xf32>
    %c0_22 = arith.constant 0 : index
    %c0_23 = arith.constant 0 : index
    %123 = vector.load %arg9[%c0_22, %c0_23] : memref<8x512xf32, #tpu.memory_space<vmem>>, vector<8x512xf32>
    %c0_24 = arith.constant 0 : index
    %c0_25 = arith.constant 0 : index
    %124 = vector.load %arg5[%c0_24, %c0_25] : memref<8x1xf32, #tpu.memory_space<vmem>>, vector<8x1xf32>
    %125 = vector.shape_cast %124 : vector<8x1xf32> to vector<8x1xf32>
    %126 = vector.broadcast %125 : vector<8x1xf32> to vector<8x256xf32>
    %127 = vector.extract_strided_slice %123 {offsets = [0, 111], sizes = [8, 256], strides = [1, 1]} : vector<8x512xf32> to vector<8x256xf32>
    %128 = arith.mulf %127, %68 : vector<8x256xf32>
    %129 = arith.addf %126, %128 : vector<8x256xf32>
    %130 = vector.extract_strided_slice %123 {offsets = [0, 112], sizes = [8, 256], strides = [1, 1]} : vector<8x512xf32> to vector<8x256xf32>
    %131 = arith.mulf %130, %71 : vector<8x256xf32>
    %132 = arith.addf %129, %131 : vector<8x256xf32>
    %133 = vector.extract_strided_slice %123 {offsets = [0, 113], sizes = [8, 256], strides = [1, 1]} : vector<8x512xf32> to vector<8x256xf32>
    %134 = arith.mulf %133, %80 : vector<8x256xf32>
    %135 = arith.addf %132, %134 : vector<8x256xf32>
    %136 = vector.extract_strided_slice %123 {offsets = [0, 127], sizes = [8, 256], strides = [1, 1]} : vector<8x512xf32> to vector<8x256xf32>
    %137 = arith.mulf %136, %89 : vector<8x256xf32>
    %138 = arith.addf %135, %137 : vector<8x256xf32>
    %139 = vector.extract_strided_slice %123 {offsets = [0, 128], sizes = [8, 256], strides = [1, 1]} : vector<8x512xf32> to vector<8x256xf32>
    %140 = arith.mulf %139, %92 : vector<8x256xf32>
    %141 = arith.addf %138, %140 : vector<8x256xf32>
    %142 = vector.extract_strided_slice %123 {offsets = [0, 129], sizes = [8, 256], strides = [1, 1]} : vector<8x512xf32> to vector<8x256xf32>
    %143 = arith.mulf %142, %101 : vector<8x256xf32>
    %144 = arith.addf %141, %143 : vector<8x256xf32>
    %145 = vector.extract_strided_slice %123 {offsets = [0, 143], sizes = [8, 256], strides = [1, 1]} : vector<8x512xf32> to vector<8x256xf32>
    %146 = arith.mulf %145, %110 : vector<8x256xf32>
    %147 = arith.addf %144, %146 : vector<8x256xf32>
    %148 = vector.extract_strided_slice %123 {offsets = [0, 144], sizes = [8, 256], strides = [1, 1]} : vector<8x512xf32> to vector<8x256xf32>
    %149 = arith.mulf %148, %113 : vector<8x256xf32>
    %150 = arith.addf %147, %149 : vector<8x256xf32>
    %151 = vector.extract_strided_slice %123 {offsets = [0, 145], sizes = [8, 256], strides = [1, 1]} : vector<8x512xf32> to vector<8x256xf32>
    %152 = arith.mulf %151, %122 : vector<8x256xf32>
    %153 = arith.addf %150, %152 : vector<8x256xf32>
    %cst_26 = arith.constant 0.000000e+00 : f32
    %154 = vector.broadcast %cst_26 : f32 to vector<8x256xf32>
    %155 = arith.subf %154, %153 : vector<8x256xf32>
    %156 = math.exp %155 : vector<8x256xf32>
    %cst_27 = arith.constant 1.000000e+00 : f32
    %157 = vector.broadcast %cst_27 : f32 to vector<8x256xf32>
    %158 = arith.addf %157, %156 : vector<8x256xf32>
    %159 = tpu.reciprocal %158 {approx = true} : vector<8x256xf32> -> vector<8x256xf32>
    %160 = arith.mulf %153, %159 : vector<8x256xf32>
    %c0_28 = arith.constant 0 : index
    %c0_29 = arith.constant 0 : index
    %161 = vector.load %arg6[%c0_28, %c0_29] : memref<4x8xf32, #tpu.memory_space<vmem>>, vector<4x8xf32>
    %c0_30 = arith.constant 0 : index
    %c0_31 = arith.constant 0 : index
    %162 = vector.load %arg7[%c0_30, %c0_31] : memref<4x1xf32, #tpu.memory_space<vmem>>, vector<4x1xf32>
    %163 = vector.shape_cast %162 : vector<4x1xf32> to vector<4x1xf32>
    %164 = vector.broadcast %163 : vector<4x1xf32> to vector<4x256xf32>
    %165 = vector.extract_strided_slice %161 {offsets = [0, 0], sizes = [4, 1], strides = [1, 1]} : vector<4x8xf32> to vector<4x1xf32>
    %166 = vector.extract_strided_slice %160 {offsets = [0, 0], sizes = [1, 256], strides = [1, 1]} : vector<8x256xf32> to vector<1x256xf32>
    %167 = vector.broadcast %165 : vector<4x1xf32> to vector<4x256xf32>
    %168 = vector.broadcast %166 : vector<1x256xf32> to vector<4x256xf32>
    %169 = arith.mulf %167, %168 : vector<4x256xf32>
    %170 = arith.addf %164, %169 : vector<4x256xf32>
    %171 = vector.extract_strided_slice %161 {offsets = [0, 1], sizes = [4, 1], strides = [1, 1]} : vector<4x8xf32> to vector<4x1xf32>
    %172 = vector.extract_strided_slice %160 {offsets = [1, 0], sizes = [1, 256], strides = [1, 1]} : vector<8x256xf32> to vector<1x256xf32>
    %173 = vector.broadcast %171 : vector<4x1xf32> to vector<4x256xf32>
    %174 = vector.broadcast %172 : vector<1x256xf32> to vector<4x256xf32>
    %175 = arith.mulf %173, %174 : vector<4x256xf32>
    %176 = arith.addf %170, %175 : vector<4x256xf32>
    %177 = vector.extract_strided_slice %161 {offsets = [0, 2], sizes = [4, 1], strides = [1, 1]} : vector<4x8xf32> to vector<4x1xf32>
    %178 = vector.extract_strided_slice %160 {offsets = [2, 0], sizes = [1, 256], strides = [1, 1]} : vector<8x256xf32> to vector<1x256xf32>
    %179 = vector.broadcast %177 : vector<4x1xf32> to vector<4x256xf32>
    %180 = vector.broadcast %178 : vector<1x256xf32> to vector<4x256xf32>
    %181 = arith.mulf %179, %180 : vector<4x256xf32>
    %182 = arith.addf %176, %181 : vector<4x256xf32>
    %183 = vector.extract_strided_slice %161 {offsets = [0, 3], sizes = [4, 1], strides = [1, 1]} : vector<4x8xf32> to vector<4x1xf32>
    %184 = vector.extract_strided_slice %160 {offsets = [3, 0], sizes = [1, 256], strides = [1, 1]} : vector<8x256xf32> to vector<1x256xf32>
    %185 = vector.broadcast %183 : vector<4x1xf32> to vector<4x256xf32>
    %186 = vector.broadcast %184 : vector<1x256xf32> to vector<4x256xf32>
    %187 = arith.mulf %185, %186 : vector<4x256xf32>
    %188 = arith.addf %182, %187 : vector<4x256xf32>
    %189 = vector.extract_strided_slice %161 {offsets = [0, 4], sizes = [4, 1], strides = [1, 1]} : vector<4x8xf32> to vector<4x1xf32>
    %190 = vector.extract_strided_slice %160 {offsets = [4, 0], sizes = [1, 256], strides = [1, 1]} : vector<8x256xf32> to vector<1x256xf32>
    %191 = vector.broadcast %189 : vector<4x1xf32> to vector<4x256xf32>
    %192 = vector.broadcast %190 : vector<1x256xf32> to vector<4x256xf32>
    %193 = arith.mulf %191, %192 : vector<4x256xf32>
    %194 = arith.addf %188, %193 : vector<4x256xf32>
    %195 = vector.extract_strided_slice %161 {offsets = [0, 5], sizes = [4, 1], strides = [1, 1]} : vector<4x8xf32> to vector<4x1xf32>
    %196 = vector.extract_strided_slice %160 {offsets = [5, 0], sizes = [1, 256], strides = [1, 1]} : vector<8x256xf32> to vector<1x256xf32>
    %197 = vector.broadcast %195 : vector<4x1xf32> to vector<4x256xf32>
    %198 = vector.broadcast %196 : vector<1x256xf32> to vector<4x256xf32>
    %199 = arith.mulf %197, %198 : vector<4x256xf32>
    %200 = arith.addf %194, %199 : vector<4x256xf32>
    %201 = vector.extract_strided_slice %161 {offsets = [0, 6], sizes = [4, 1], strides = [1, 1]} : vector<4x8xf32> to vector<4x1xf32>
    %202 = vector.extract_strided_slice %160 {offsets = [6, 0], sizes = [1, 256], strides = [1, 1]} : vector<8x256xf32> to vector<1x256xf32>
    %203 = vector.broadcast %201 : vector<4x1xf32> to vector<4x256xf32>
    %204 = vector.broadcast %202 : vector<1x256xf32> to vector<4x256xf32>
    %205 = arith.mulf %203, %204 : vector<4x256xf32>
    %206 = arith.addf %200, %205 : vector<4x256xf32>
    %207 = vector.extract_strided_slice %161 {offsets = [0, 7], sizes = [4, 1], strides = [1, 1]} : vector<4x8xf32> to vector<4x1xf32>
    %208 = vector.extract_strided_slice %160 {offsets = [7, 0], sizes = [1, 256], strides = [1, 1]} : vector<8x256xf32> to vector<1x256xf32>
    %209 = vector.broadcast %207 : vector<4x1xf32> to vector<4x256xf32>
    %210 = vector.broadcast %208 : vector<1x256xf32> to vector<4x256xf32>
    %211 = arith.mulf %209, %210 : vector<4x256xf32>
    %212 = arith.addf %206, %211 : vector<4x256xf32>
    %cst_32 = arith.constant 0.000000e+00 : f32
    %213 = vector.broadcast %cst_32 : f32 to vector<4x256xf32>
    %214 = arith.subf %213, %212 : vector<4x256xf32>
    %215 = math.exp %214 : vector<4x256xf32>
    %cst_33 = arith.constant 1.000000e+00 : f32
    %216 = vector.broadcast %cst_33 : f32 to vector<4x256xf32>
    %217 = arith.addf %216, %215 : vector<4x256xf32>
    %218 = tpu.reciprocal %217 {approx = true} : vector<4x256xf32> -> vector<4x256xf32>
    %219 = arith.mulf %212, %218 : vector<4x256xf32>
    %220 = arith.truncf %219 : vector<4x256xf32> to vector<4x256xbf16>
    %c0_34 = arith.constant 0 : index
    %c0_35 = arith.constant 0 : index
    %c0_36 = arith.constant 0 : index
    %221 = vector.load %arg8[%c0_34, %c0_35, %c0_36] : memref<1x4x256xbf16, #tpu.memory_space<vmem>>, vector<1x4x256xbf16>
    %222 = vector.shape_cast %221 : vector<1x4x256xbf16> to vector<4x256xbf16>
    %223 = vector.shape_cast %220 : vector<4x256xbf16> to vector<1x4x256xbf16>
    tpu.vector_store %arg8[%c0_34, %c0_35, %c0_36], %223 {strides = array<i32>} : memref<1x4x256xbf16, #tpu.memory_space<vmem>>, vector<1x4x256xbf16>,
    return
  }
  func.func @transform_0(%arg0: i32) -> (i32, i32, i32) {
    %c0_i32 = arith.constant 0 : i32
    %c0_i32_0 = arith.constant 0 : i32
    %c0_i32_1 = arith.constant 0 : i32
    return %arg0, %c0_i32, %c0_i32_0 : i32, i32, i32
  }
  func.func @transform_1(%arg0: i32) -> (i32, i32) {
    %c0_i32 = arith.constant 0 : i32
    %c0_i32_0 = arith.constant 0 : i32
    %c0_i32_1 = arith.constant 0 : i32
    return %c0_i32, %c0_i32_0 : i32, i32
  }
  func.func @transform_2(%arg0: i32) -> (i32, i32) {
    %c0_i32 = arith.constant 0 : i32
    %c0_i32_0 = arith.constant 0 : i32
    %c0_i32_1 = arith.constant 0 : i32
    return %c0_i32, %c0_i32_0 : i32, i32
  }
  func.func @transform_3(%arg0: i32) -> (i32, i32) {
    %c0_i32 = arith.constant 0 : i32
    %c0_i32_0 = arith.constant 0 : i32
    %c0_i32_1 = arith.constant 0 : i32
    return %c0_i32, %c0_i32_0 : i32, i32
  }
  func.func @transform_4(%arg0: i32) -> (i32, i32) {
    %c0_i32 = arith.constant 0 : i32
    %c0_i32_0 = arith.constant 0 : i32
    %c0_i32_1 = arith.constant 0 : i32
    return %c0_i32, %c0_i32_0 : i32, i32
  }
  func.func @transform_5(%arg0: i32) -> (i32, i32) {
    %c0_i32 = arith.constant 0 : i32
    %c0_i32_0 = arith.constant 0 : i32
    %c0_i32_1 = arith.constant 0 : i32
    return %c0_i32, %c0_i32_0 : i32, i32
  }
  func.func @transform_6(%arg0: i32) -> (i32, i32) {
    %c0_i32 = arith.constant 0 : i32
    %c0_i32_0 = arith.constant 0 : i32
    %c0_i32_1 = arith.constant 0 : i32
    return %c0_i32, %c0_i32_0 : i32, i32
  }
  func.func @transform_7(%arg0: i32) -> (i32, i32, i32) {
    %c0_i32 = arith.constant 0 : i32
    %c0_i32_0 = arith.constant 0 : i32
    %c0_i32_1 = arith.constant 0 : i32
    return %arg0, %c0_i32, %c0_i32_0 : i32, i32, i32
  }
}

</mosaic_0001>

<bundles_post_ra>
// kernel: tpu_custom_call.1
= control target key start
LH: loop header
LB: loop body
LE: loop exit
PB: predicated region body
PF: predicated region fallthrough
CT: control target
= control target key end

     0   :  { %12 = vsyncpa [#allocation4], 0  ;;  %s1418_s0 = inlined_call_operand.vmem [shape: bf16[2,4,256], index: 0, kind: input, shape index: {}]   ;;  %s1419_s1 = inlined_call_operand.vmem [shape: f32[8,4], index: 1, kind: input, shape index: {}]   ;;  %s1420_s2 = inlined_call_operand.vmem [shape: f32[8,1], index: 2, kind: input, shape index: {}]   ;;  %s1421_s3 = inlined_call_operand.vmem [shape: f32[8,9], index: 3, kind: input, shape index: {}]   ;;  %s1422_s4 = inlined_call_operand.vmem [shape: f32[8,1], index: 4, kind: input, shape index: {}]   ;;  %s1423_s5 = inlined_call_operand.vmem [shape: f32[4,8], index: 5, kind: input, shape index: {}]   ;;  %s1424_s6 = inlined_call_operand.vmem [shape: f32[4,1], index: 6, kind: input, shape index: {}]   ;;  %s1425_s7 = inlined_call_operand.hbm [shape: bf16[2,4,256], index: 7, kind: output, shape index: {}]  }
   0x1   :  { %14 = vsyncpa [#allocation4 + $0x1], 0  ;;  %s1202_s24 = smov 0   ;;  %s1204_s25 = smov 0  }
   0x2   :  { %s1206_s26 = smov 0   ;;  %s1208_s27 = smov 0  }
   0x3 LB: > { %s1223_s28 = sadd.s32 4294967295, %s1138_s27   ;;  %s941_s29 = sadd.s32 4294967294, %s1138_s27   ;;  %s1138_s27 = sphi %s1208_s27, %s1431_s27   ;;  %s1134_s26 = sphi %s1206_s26, %s1430_s26   ;;  %s1130_s25 = sphi %s1204_s25, %s1429_s25   ;;  %s1126_s24 = sphi %s1202_s24, %s1428_s24  }
   0x4   : > { %s1227_s30 = sadd.s32 1, %s1138_s27   ;;  %s179_s8 = sadd.s32 1, %s1134_s26 }
   0x5   : > { %s176_s9 = ssub.s32 %s1138_s27, %s1227_s30  ;;  %p189_p0 = scmp.ne.s32.totalorder %s1134_s26, %s1130_s25 }
   0x6   : > { %p177_p1 = scmp.eq.s32.totalorder %s176_s9, 0  ;;  %p190_p2 = scmp.eq.s32.totalorder %s1223_s28, 1 }
   0x7   : > { %p195_p3 = scmp.ne.s32.totalorder %s1130_s25, %s1126_s24  ;;  %p196_p4 = scmp.eq.s32.totalorder %s941_s29, 1 }
   0x8   : > { %s1238_s10 = scalar_select %p177_p1, %s1134_s26, %s179_s8  }
   0x9   : > { %p1240_p5 = por %p190_p2, %p189_p0  ;;  %p1244_p6 = por %p196_p4, %p195_p3 }
   0xa   : > { %p944_p7 = scmp.ge.s32.totalorder %s1138_s27, 1  ;;  %p240_p8 = scmp.lt.s32.totalorder %s1138_s27, 3 }
   0xc   : > { %p241_p9 = pnand %p944_p7, %p240_p8 }
   0xd   : > { %p272_p10 = scmp.lt.s32.totalorder (!%p241_p9), %s1223_s28, 1  ;;  %s1150_s9 = smov (!%p241_p9), 113  }
   0xe   : > { %244 = sbr.rel (%p241_p9) target bundleno = 575 (0x23f), region = 48  ;;  %s1151_s13 = smov (!%p241_p9), 127  }
   0xf   : > { %s1152_s14 = smov (!%p241_p9), 1   ;;  %s1153_s15 = smov (!%p241_p9), 15  }
  0x10   : > { %s1154_s16 = smov (!%p241_p9), 17   ;;  %s1155_s17 = smov (!%p241_p9), 111  }
  0x11   : > { %s1156_s18 = smov (!%p241_p9), 95   ;;  %s1157_s19 = smov (!%p241_p9), 126  }
  0x12   : > { %s1158_s20 = smov (!%p241_p9), 110   ;;  %s1161_s23 = smov (!%p241_p9), 94  }
  0x13   : > { %v387_v0 = vld [vmem:[%s1421_s3] sm:$0xff]  ;;  %v1140_v1 = vmov 5   ;;  %v1141_v2 = vmov 2   ;;  %v1142_v3 = vmov 6   ;;  %v1143_v5 = vmov 3   ;;  %s273_s21 = scalar_select %p272_p10, %s1223_s28, 1 }
  0x14   : > { %1022 = vset.pattern.permute.xlu1 %v1140_v1  ;;  %1020 = vset.pattern.permute.xlu0 %v1141_v2  ;;  %v279_v4 = vld [vmem:[%s1419_s1] sm:$0xff]  ;;  %v1144_v6 = vmov 0   ;;  %v1145_v8 = vmov 1   ;;  %v1146_v9 = vmov 8   ;;  %v1147_v10 = vmov 4  }
  0x15   : > { %428 = vperm.xlu1 %1022, %v387_v0   ;;  %406 = vperm.xlu0 %1020, %v387_v0   ;;  %v280_v7 = vld [vmem:[%s1420_s2] sm:$0xff]  ;;  %v1148_v11 = vmov 7   ;;  %v360_v13 = vlaneseq  ;;  %s957_s22 = sshll.u32 %s273_s21, 2  ;;  %v1149_v18 = vmov 0.0   ;;  %vm503_vm4 = vcmask 924672   ;;  %s1159_s21 = smov 96  }
  0x16   : > { %1024 = vset.pattern.permute.xlu2 %v1142_v3  ;;  %v453_v12 = vld [vmem:[%s1422_s4] sm:$0xff]  ;;  %s276_s8 = scalar_lea.vmem %s1418_s0, %s957_s22  ;;  %s1160_s22 = smov 112   ;;  %vm488_vm5 = vcmask 1039360   ;;  %vm581_vm6 = vcmask 7168   ;;  %vm613_vm7 = vcmask 121856   ;;  %vm666_vm8 = vcmask 138240  }
  0x17   : > { %434 = vperm.xlu2 %1024, %v387_v0   ;;  %v361_v14 = vand.u32 127, %v360_v13  ;;  %v277_v22 = vld [vmem:[%s276_s8] sm:$0xf]  ;;  %vm465_vm9 = vcmask 908288   ;;  %vm520_vm10 = vcmask 1031168   ;;  %vm551_vm11 = vcmask 916480  }
  0x18   : > { %v278_v27 = vunpack.c.l.bf16 %v277_v22  ;;  %vm598_vm12 = vcmask 900096   ;;  %vm630_vm13 = vcmask 785408   ;;  %vm651_vm14 = vcmask 777216  }
  0x19   : > { %v362_v15 = vadd.s32 128, %v361_v14  ;;  %v367_v16 = vand.u32 15, %v361_v14  ;;  %vm683_vm15 = vcmask 769024  }
  0x1a   : > { %v292_v28 = vperm.slane %v278_v27, 0  ;;  %v293_v29 = vperm.slane %v278_v27, 4  ;;  %v306_v39 = vperm.slane %v278_v27, 1  ;;  %v307_v40 = vperm.slane %v278_v27, 5 }
  0x1b   : > { %v374_v17 = vand.u32 15, %v362_v15  ;;  %vm409_vm0 = vcmp.lt.s32.totalorder %v367_v16, 15  ;;  %vm393_vm2 = vcmp.ge.s32.totalorder %v367_v16, 1  ;;  %v320_v43 = vperm.slane %v278_v27, 2 }
  0x1c   : > { %v1275_v19 = vsel %vm409_vm0, 1.0, %v1149_v18  ;;  %v1281_v30 = vsel %vm393_vm2, 1.0, %v1149_v18  ;;  %v296_v37 = vperm.slane %v292_v28, 0  ;;  %v297_v38 = vperm.slane %v293_v29, 0 }
  0x1d   : > { %1021 = vset.pattern.permute.xlu0 %v1143_v5  ;;  %1023 = vset.pattern.permute.xlu1 %v1144_v6  ;;  %vm410_vm1 = vcmp.lt.s32.totalorder %v374_v17, 15  ;;  %vm394_vm3 = vcmp.ge.s32.totalorder %v374_v17, 1  ;;  %v321_v44 = vperm.slane %v278_v27, 6  ;;  %v310_v45 = vperm.slane %v306_v39, 1 }
  0x1e   : > { %418 = vperm.xlu0 %1021, %v387_v0   ;;  %288 = vperm.xlu1 %1023, %v279_v4   ;;  %v1277_v20 = vsel %vm410_vm1, 1.0, %v1149_v18  ;;  %v1283_v31 = vsel %vm394_vm3, 1.0, %v1149_v18  ;;  %v311_v46 = vperm.slane %v307_v40, 1  ;;  %v324_v52 = vperm.slane %v320_v43, 2 }
  0x1f   : > { %1025 = vset.pattern.permute.xlu2 %v1144_v6  ;;  %v325_v53 = vperm.slane %v321_v44, 2  ;;  %v334_v57 = vperm.slane %v278_v27, 3  ;;  %v335_v58 = vperm.slane %v278_v27, 7  ;;  %vm851_vm0 = vcmask 1045508  }
  0x20   : > { %283 = vperm.xlu2 %1025, %v280_v7   ;;  %vm847_vm1 = vcmask 1041408   ;;  %vm855_vm2 = vcmask 1043456  }
  0x26   : > { %1026 = vset.pattern.permute.xlu1 %v1145_v8  ;;  %1028 = vset.pattern.permute.xlu0 %v1146_v9 }
  0x27   : > { %303 = vperm.xlu1 %1026, %v279_v4   ;;  %444 = vperm.xlu0 %1028, %v387_v0  }
  0x28   : > { %1027 = vset.pattern.permute.xlu2 %v1141_v2 }
  0x29   : > { %317 = vperm.xlu2 %1027, %v279_v4  }
  0x2f   : > { %1029 = vset.pattern.permute.xlu1 %v1143_v5  ;;  %1032 = vset.pattern.permute.xlu0 %v1147_v10 }
  0x30   : > { %331 = vperm.xlu1 %1029, %v279_v4   ;;  %424 = vperm.xlu0 %1032, %v387_v0   ;;  %v338_v4 = vperm.slane %v334_v57, 3 }
  0x31   : > { %1030 = vset.pattern.permute.xlu2 %v1144_v6 }
  0x32   : > { %390 = vperm.xlu2 %1030, %v387_v0  }
  0x38   : > { %1031 = vset.pattern.permute.xlu1 %v1145_v8  ;;  %1033 = vset.pattern.permute.xlu0 %v1148_v11 }
  0x39   : > { %402 = vperm.xlu1 %1031, %v387_v0   ;;  %440 = vperm.xlu0 %1033, %v387_v0  }
  0x41   : > { %1034 = vset.pattern.permute.xlu0 %v1144_v6  ;;  %1035 = vset.pattern.permute.xlu1 %v1144_v6  ;;  %v339_v6 = vperm.slane %v335_v58, 3 }
  0x42   : > { %456 = vperm.xlu0 %1034, %v453_v12  }
  0x4a   : > { %1036 = vset.pattern.permute.xlu0 %v1145_v8 }
  0x71   : > { %v435_v21 = vpop.permute.xlu2 %434 }
  0x72   : > { %v437_v63 = vmul.f32 %v1281_v30, %v435_v21  ;;  %v438_v0 = vmul.f32 %v1283_v31, %v435_v21 }
  0x7a   : > { %v284_v32 = vpop.permute.xlu2 %283 }
  0x83   : > { %v318_v56 = vpop.permute.xlu2 %317 }
  0x84   : > { %v326_v61 = vmul.f32 %v324_v52, %v318_v56  ;;  %v327_v62 = vmul.f32 %v325_v53, %v318_v56 }
  0x87   : > { %v407_v23 = vpop.permute.xlu0 %406  ;;  %v429_v24 = vpop.permute.xlu1 %428 }
  0x88   : > { %v415_v25 = vmul.f32 %v1275_v19, %v407_v23  ;;  %v416_v26 = vmul.f32 %v1277_v20, %v407_v23  ;;  %v431_v47 = vmul.f32 %v1275_v19, %v429_v24  ;;  %v432_v48 = vmul.f32 %v1277_v20, %v429_v24 }
  0x8a   : > { %501 = vrot.lane.b32.xlu0 %v416_v26, %s1150_s9  ;;  %499 = vrot.lane.b32.xlu2 %v415_v25, %s1150_s9 }
  0x8c   : > { %v391_v25 = vpop.permute.xlu2 %390 }
  0x8d   : > { %v399_v26 = vmul.f32 %v1281_v30, %v391_v25  ;;  %v400_v27 = vmul.f32 %v1283_v31, %v391_v25 }
  0x90   : > { %v419_v33 = vpop.permute.xlu0 %418  ;;  %v289_v34 = vpop.permute.xlu1 %288 }
  0x91   : > { %v421_v35 = vmul.f32 %v1281_v30, %v419_v33  ;;  %v422_v36 = vmul.f32 %v1283_v31, %v419_v33  ;;  %v298_v41 = vmul.f32 %v296_v37, %v289_v34  ;;  %v299_v42 = vmul.f32 %v297_v38, %v289_v34 }
  0x93   : > { %533 = vrot.lane.b32.xlu2 %v422_v36, %s1151_s13  ;;  %531 = vrot.lane.b32.xlu1 %v421_v35, %s1151_s13  ;;  %v300_v49 = vadd.f32 %v298_v41, %v284_v32  ;;  %v301_v50 = vadd.f32 %v299_v42, %v284_v32 }
  0x99   : > { %v304_v51 = vpop.permute.xlu1 %303  ;;  %v445_v14 = vpop.permute.xlu0 %444 }
  0x9a   : > { %v312_v54 = vmul.f32 %v310_v45, %v304_v51  ;;  %v313_v55 = vmul.f32 %v311_v46, %v304_v51  ;;  %v447_v22 = vmul.f32 %v1275_v19, %v445_v14  ;;  %v448_v23 = vmul.f32 %v1277_v20, %v445_v14 }
  0x9b   : > { %579 = vrot.lane.b32.xlu2 %v432_v48, %s1152_s14  ;;  %577 = vrot.lane.b32.xlu1 %v431_v47, %s1152_s14  ;;  %s269_s14 = sand.u32 1, %s1130_s25  }
  0x9c   : > { %v314_v59 = vadd.f32 %v312_v54, %v300_v49  ;;  %v315_v60 = vadd.f32 %v313_v55, %v301_v50  ;;  %s866_s29 = scalar_lea.sflag [#allocation4], %s269_s14 }
  0x9e   : > { %v328_v7 = vadd.f32 %v326_v61, %v314_v59  ;;  %v329_v8 = vadd.f32 %v327_v62, %v315_v60 }
  0xa2   : > { %v332_v9 = vpop.permute.xlu1 %331  ;;  %v425_v30 = vpop.permute.xlu0 %424 }
  0xa3   : > { %v340_v12 = vmul.f32 %v338_v4, %v332_v9  ;;  %v341_v13 = vmul.f32 %v339_v6, %v332_v9  ;;  %611 = vrot.lane.b32.xlu2 %v438_v0, %s1153_s15  ;;  %609 = vrot.lane.b32.xlu1 %v437_v63, %s1153_s15  ;;  %s945_s15 = sshll.u32 %s269_s14, 2 }
  0xa5   : > { %v342_v15 = vadd.f32 %v340_v12, %v328_v7  ;;  %v343_v16 = vadd.f32 %v341_v13, %v329_v8 }
  0xa7   : > { %v344_v17 = vsub.f32 0.0, %v342_v15  ;;  %v345_v18 = vsub.f32 0.0, %v343_v16 }
  0xa9   : > { %v346_v21 = vmul.f32 1.442695, %v344_v17  ;;  %v348_v24 = vmul.f32 1.442695, %v345_v18 }
  0xab   : > { %1044 = vpow2.f32 %v346_v21  ;;  %664 = vrot.lane.b32.xlu2 %v448_v23, %s1154_s16  ;;  %662 = vrot.lane.b32.xlu1 %v447_v22, %s1154_s16  ;;  %v403_v20 = vpop.permute.xlu1 %402  ;;  %v441_v41 = vpop.permute.xlu0 %440  ;;  %v710_v23 = vld [vmem:[%s1423_s5] sm:$0xf] }
  0xac   : > { %1046 = vpow2.f32 %v348_v24  ;;  %v476_v33 = vmul.f32 0.0, %v403_v20  ;;  %v641_v6 = vmul.f32 0.0, %v441_v41  ;;  %v711_v21 = vld [vmem:[%s1424_s6] sm:$0xf] }
  0xb1   : > { %v1045_v28 = vpop.eup %1044 }
  0xb2   : > { %v1047_v29 = vpop.eup %1046  ;;  %v350_v32 = vadd.f32 1.0, %v1045_v28 }
  0xb3   : > { %v351_v19 = vadd.f32 1.0, %v1047_v29  ;;  %463 = vrot.lane.b32.xlu2 %v400_v27, %s1155_s17  ;;  %461 = vrot.lane.b32.xlu1 %v399_v26, %s1155_s17 }
  0xb4   : > { %1048 = vrcp.f32 %v350_v32  ;;  %v1314_v47 = vpop.permute.xlu0 %456 }
  0xb5   : > { %1050 = vrcp.f32 %v351_v19 }
  0xba   : > { %v1049_v34 = vpop.eup %1048 }
  0xbb   : > { %v1051_v35 = vpop.eup %1050  ;;  %v1299_v36 = vmul.f32 %v1049_v34, %v342_v15  ;;  %482 = vrot.lane.b32.xlu1 %v476_v33, %s1151_s13 }
  0xbc   : > { %v1302_v37 = vmul.f32 %v1051_v35, %v343_v16 }
  0xbd   : > { %v477_v31 = vmul.f32 %v403_v20, %v1299_v36  ;;  %v560_v40 = vmul.f32 %v425_v30, %v1299_v36  ;;  %v639_v42 = vmul.f32 %v441_v41, %v1299_v36 }
  0xbe   : > { %v561_v38 = vmul.f32 %v425_v30, %v1302_v37  ;;  %v478_v39 = vmul.f32 %v403_v20, %v1302_v37  ;;  %v640_v43 = vmul.f32 %v441_v41, %v1302_v37 }
  0xbf   : > { %484 = vrot.lane.b32.xlu2 %v477_v31, %s1151_s13 }
  0xc0   : > { %566 = vrot.lane.b32.xlu0 %v561_v38, %s1155_s17 }
  0xc3   : > { %486 = vrot.lane.b32.xlu1 %v478_v39, %s1151_s13  ;;  %s1096_s13 = scalar_lea.hbm %s1425_s7, 8 }
  0xc7   : > { %564 = vrot.lane.b32.xlu2 %v560_v40, %s1155_s17  ;;  %s958_s17 = sshll.u32 %s1223_s28, 2 }
  0xcb   : > { %645 = vrot.lane.b32.xlu1 %v639_v42, %s1156_s18 }
  0xcf   : > { %647 = vrot.lane.b32.xlu2 %v640_v43, %s1156_s18 }
  0xe4   : > { %v500_v44 = vpop.permute.xlu2 %499 }
  0xe5   : > { %v508_v45 = vmul.f32 0.0, %v500_v44 }
  0xe7   : > { %514 = vrot.lane.b32.xlu2 %v508_v45, %s1157_s19 }
  0xed   : > { %v534_v46 = vpop.permute.xlu2 %533 }
  0xee   : > { %v541_v55 = vmul.f32 %v534_v46, %v1302_v37 }
  0xf5   : > { %v580_v48 = vpop.permute.xlu2 %579 }
  0xf6   : > { %v588_v49 = vmul.f32 0.0, %v580_v48 }
  0xf8   : > { %596 = vrot.lane.b32.xlu0 %v588_v49, %s1158_s20 }
  0xfc   : > { %v502_v50 = vpop.permute.xlu0 %501 }
  0xfd   : > { %v510_v51 = vmul.f32 %v502_v50, %v1302_v37  ;;  %v612_v52 = vpop.permute.xlu2 %611  ;;  %v504_v54 = vsel %vm503_vm4, %v500_v44, %v502_v50 }
  0xfe   : > { %v620_v53 = vmul.f32 0.0, %v612_v52  ;;  %v509_v57 = vmul.f32 %v504_v54, %v1299_v36 }
  0xff   : > { %518 = vrot.lane.b32.xlu1 %v510_v51, %s1157_s19 }
 0x100   : > { %628 = vrot.lane.b32.xlu0 %v620_v53, %s1159_s21 }
 0x105   : > { %v532_v56 = vpop.permute.xlu1 %531  ;;  %v665_v12 = vpop.permute.xlu2 %664 }
 0x106   : > { %v539_v58 = vmul.f32 0.0, %v532_v56  ;;  %v535_v59 = vsel %vm488_vm5, %v532_v56, %v534_v46  ;;  %v673_v14 = vmul.f32 0.0, %v665_v12 }
 0x107   : > { %549 = vrot.lane.b32.xlu1 %v541_v55, %s1160_s22  ;;  %v540_v61 = vmul.f32 %v535_v59, %v1299_v36 }
 0x108   : > { %516 = vrot.lane.b32.xlu0 %v509_v57, %s1157_s19  ;;  %545 = vrot.lane.b32.xlu2 %v539_v58, %s1160_s22 }
 0x10d   : > { %v578_v60 = vpop.permute.xlu1 %577  ;;  %v464_v18 = vpop.permute.xlu2 %463 }
 0x10e   : > { %v582_v62 = vsel %vm581_vm6, %v578_v60, %v580_v48  ;;  %v586_v63 = vmul.f32 %v578_v60, %v1299_v36 }
 0x10f   : > { %v587_v0 = vmul.f32 %v582_v62, %v1302_v37 }
 0x110   : > { %592 = vrot.lane.b32.xlu1 %v586_v63, %s1158_s20  ;;  %547 = vrot.lane.b32.xlu0 %v540_v61, %s1160_s22 }
 0x111   : > { %594 = vrot.lane.b32.xlu2 %v587_v0, %s1158_s20  ;;  %s877_s20 = scalar_lea.hbm %s1425_s7, %s958_s17 }
 0x115   : > { %v610_v4 = vpop.permute.xlu1 %609 }
 0x116   : > { %v614_v7 = vsel %vm613_vm7, %v610_v4, %v612_v52  ;;  %v618_v8 = vmul.f32 %v610_v4, %v1299_v36 }
 0x117   : > { %v619_v9 = vmul.f32 %v614_v7, %v1302_v37 }
 0x118   : > { %624 = vrot.lane.b32.xlu1 %v618_v8, %s1159_s21  ;;  %649 = vrot.lane.b32.xlu0 %v641_v6, %s1156_s18 }
 0x119   : > { %626 = vrot.lane.b32.xlu2 %v619_v9, %s1159_s21  ;;  %v485_v25 = vpop.permute.xlu2 %484  ;;  %s271_s21 = scalar_lea.vmem [#allocation3], %s945_s15 }
 0x11a   : > { %s879_s22 = sshll.u32 %s271_s21, 4  ;;  %s880_s22 = int_to_ptr.vmem [resolvable:$true] %s879_s22 }
 0x11d   : > { %v663_v13 = vpop.permute.xlu1 %662 }
 0x11e   : > { %v667_v15 = vsel %vm666_vm8, %v663_v13, %v665_v12  ;;  %v671_v16 = vmul.f32 %v663_v13, %v1299_v36 }
 0x11f   : > { %v672_v17 = vmul.f32 %v667_v15, %v1302_v37 }
 0x120   : > { %677 = vrot.lane.b32.xlu1 %v671_v16, %s1161_s23  ;;  %681 = vrot.lane.b32.xlu0 %v673_v14, %s1161_s23 }
 0x121   : > { %679 = vrot.lane.b32.xlu2 %v672_v17, %s1161_s23  ;;  %s881_s23 = sshll.u32 %s877_s20, 4  ;;  %s882_s23 = int_to_ptr.hbm [resolvable:$true] %s881_s23 }
 0x125   : > { %v462_v22 = vpop.permute.xlu1 %461 }
 0x126   : > { %v470_v24 = vmul.f32 0.0, %v462_v22  ;;  %v466_v28 = vsel %vm465_vm9, %v462_v22, %v464_v18 }
 0x127   : > { %v471_v19 = vmul.f32 %v466_v28, %v1299_v36 }
 0x128   : > { %719 = vperm.xlu1 %1035, %v710_v23   ;;  %732 = vperm.xlu0 %1036, %v710_v23   ;;  %v473_v26 = vadd.f32 %v470_v24, %v1314_v47 }
 0x129   : > { %714 = vperm.xlu2 %1030, %v711_v21   ;;  %v474_v33 = vadd.f32 %v471_v19, %v1314_v47 }
 0x12d   : > { %v483_v27 = vpop.permute.xlu1 %482 }
 0x12e   : > { %v489_v29 = vsel %vm488_vm5, %v483_v27, %v485_v25 }
 0x12f   : > { %v494_v32 = vadd.f32 %v489_v29, %v473_v26 }
 0x130   : > { %1037 = vset.pattern.permute.xlu1 %v1141_v2  ;;  %1041 = vset.pattern.permute.xlu0 %v1142_v3  ;;  %v565_v2 = vpop.permute.xlu2 %564 }
 0x131   : > { %745 = vperm.xlu1 %1037, %v710_v23   ;;  %797 = vperm.xlu0 %1041, %v710_v23  }
 0x132   : > { %1038 = vset.pattern.permute.xlu2 %v1143_v5  ;;  %v567_v3 = vpop.permute.xlu0 %566 }
 0x133   : > { %758 = vperm.xlu2 %1038, %v710_v23   ;;  %v568_v57 = vsel %vm465_vm9, %v565_v2, %v567_v3 }
 0x135   : > { %v487_v20 = vpop.permute.xlu1 %486 }
 0x136   : > { %v490_v34 = vsel %vm488_vm5, %v485_v25, %v487_v20 }
 0x137   : > { %v495_v35 = vadd.f32 %v490_v34, %v474_v33 }
 0x138   : > { %v648_v5 = vpop.permute.xlu2 %647 }
 0x139   : > { %1039 = vset.pattern.permute.xlu1 %v1147_v10  ;;  %1043 = vset.pattern.permute.xlu0 %v1148_v11  ;;  %v472_v10 = vmul.f32 %v464_v18, %v1302_v37 }
 0x13a   : > { %771 = vperm.xlu1 %1039, %v710_v23  }
 0x13b   : > { %1040 = vset.pattern.permute.xlu2 %v1140_v1  ;;  %v475_v1 = vadd.f32 %v472_v10, %v1314_v47 }
 0x13c   : > { %784 = vperm.xlu2 %1040, %v710_v23  }
 0x13d   : > { %v646_v36 = vpop.permute.xlu1 %645  ;;  %v496_v45 = vadd.f32 %v487_v20, %v475_v1 }
 0x13e   : > { %v652_v15 = vsel %vm651_vm14, %v646_v36, %v648_v5 }
 0x141   : > { %v515_v31 = vpop.permute.xlu2 %514 }
 0x142   : > { %1042 = vset.pattern.permute.xlu1 %v1148_v11 }
 0x143   : > { %810 = vperm.xlu1 %1042, %v710_v23  }
 0x162   : > { %v546_v40 = vpop.permute.xlu2 %545 }
 0x16a   : > { %v597_v30 = vpop.permute.xlu0 %596 }
 0x16b   : > { %v595_v43 = vpop.permute.xlu2 %594 }
 0x16c   : > { %v600_v63 = vsel %vm598_vm12, %v595_v43, %v597_v30 }
 0x171   : > { %v519_v38 = vpop.permute.xlu1 %518 }
 0x172   : > { %v629_v39 = vpop.permute.xlu0 %628  ;;  %v528_v46 = vadd.f32 %v519_v38, %v496_v45 }
 0x173   : > { %v627_v58 = vpop.permute.xlu2 %626 }
 0x174   : > { %v632_v12 = vsel %vm630_vm13, %v627_v58, %v629_v39 }
 0x179   : > { %v550_v41 = vpop.permute.xlu1 %549 }
 0x17a   : > { %v517_v42 = vpop.permute.xlu0 %516  ;;  %v559_v54 = vadd.f32 %v550_v41, %v528_v46 }
 0x17b   : > { %v521_v44 = vsel %vm520_vm10, %v515_v31, %v517_v42  ;;  %v522_v11 = vsel %vm520_vm10, %v517_v42, %v519_v38  ;;  %v680_v16 = vpop.permute.xlu2 %679 }
 0x17c   : > { %v526_v48 = vadd.f32 %v521_v44, %v494_v32  ;;  %v527_v49 = vadd.f32 %v522_v11, %v495_v35  ;;  %v574_v47 = vadd.f32 %v567_v3, %v559_v54 }
 0x17e   : > { %v606_v6 = vadd.f32 %v600_v63, %v574_v47 }
 0x180   : > { %v638_v14 = vadd.f32 %v632_v12, %v606_v6 }
 0x182   : > { %v593_v50 = vpop.permute.xlu1 %592  ;;  %v548_v51 = vpop.permute.xlu0 %547 }
 0x183   : > { %v552_v52 = vsel %vm551_vm11, %v546_v40, %v548_v51  ;;  %v553_v53 = vsel %vm551_vm11, %v548_v51, %v550_v41  ;;  %v599_v0 = vsel %vm598_vm12, %v593_v50, %v595_v43  ;;  %v715_v38 = vpop.permute.xlu2 %714 }
 0x184   : > { %v557_v55 = vadd.f32 %v552_v52, %v526_v48  ;;  %v558_v56 = vadd.f32 %v553_v53, %v527_v49 }
 0x186   : > { %v572_v37 = vadd.f32 %v565_v2, %v557_v55  ;;  %v573_v59 = vadd.f32 %v568_v57, %v558_v56 }
 0x188   : > { %v604_v60 = vadd.f32 %v593_v50, %v572_v37  ;;  %v605_v7 = vadd.f32 %v599_v0, %v573_v59 }
 0x18a   : > { %v625_v61 = vpop.permute.xlu1 %624  ;;  %v650_v62 = vpop.permute.xlu0 %649 }
 0x18b   : > { %v631_v4 = vsel %vm630_vm13, %v625_v61, %v627_v58  ;;  %v636_v8 = vadd.f32 %v625_v61, %v604_v60  ;;  %v653_v13 = vsel %vm651_vm14, %v648_v5, %v650_v62 }
 0x18c   : > { %v637_v9 = vadd.f32 %v631_v4, %v605_v7  ;;  %v659_v18 = vadd.f32 %v653_v13, %v638_v14 }
 0x18d   : > { %v657_v17 = vadd.f32 %v646_v36, %v636_v8  ;;  %v759_v46 = vpop.permute.xlu2 %758 }
 0x18e   : > { %v658_v23 = vadd.f32 %v652_v15, %v637_v9 }
 0x192   : > { %v678_v22 = vpop.permute.xlu1 %677  ;;  %v682_v21 = vpop.permute.xlu0 %681 }
 0x193   : > { %v684_v24 = vsel %vm683_vm15, %v678_v22, %v680_v16  ;;  %v689_v25 = vadd.f32 %v678_v22, %v657_v17  ;;  %v685_v26 = vsel %vm683_vm15, %v680_v16, %v682_v21 }
 0x194   : > { %v690_v27 = vadd.f32 %v684_v24, %v658_v23  ;;  %v691_v28 = vadd.f32 %v685_v26, %v659_v18 }
 0x195   : > { %v692_v29 = vsub.f32 0.0, %v689_v25 }
 0x196   : > { %v693_v32 = vsub.f32 0.0, %v690_v27  ;;  %v694_v19 = vsub.f32 0.0, %v691_v28 }
 0x197   : > { %v695_v20 = vmul.f32 1.442695, %v692_v29  ;;  %v785_v29 = vpop.permute.xlu2 %784 }
 0x198   : > { %v697_v33 = vmul.f32 1.442695, %v693_v32  ;;  %v699_v34 = vmul.f32 1.442695, %v694_v19 }
 0x199   : > { %1052 = vpow2.f32 %v695_v20 }
 0x19a   : > { %1054 = vpow2.f32 %v697_v33  ;;  %v720_v35 = vpop.permute.xlu1 %719  ;;  %v733_v53 = vpop.permute.xlu0 %732 }
 0x19b   : > { %1056 = vpow2.f32 %v699_v34 }
 0x19f   : > { %v1053_v2 = vpop.eup %1052 }
 0x1a0   : > { %v1055_v3 = vpop.eup %1054  ;;  %v701_v5 = vadd.f32 1.0, %v1053_v2 }
 0x1a1   : > { %v1057_v36 = vpop.eup %1056  ;;  %v702_v30 = vadd.f32 1.0, %v1055_v3 }
 0x1a2   : > { %1058 = vrcp.f32 %v701_v5  ;;  %v703_v31 = vadd.f32 1.0, %v1057_v36 }
 0x1a3   : > { %1060 = vrcp.f32 %v702_v30  ;;  %v746_v39 = vpop.permute.xlu1 %745  ;;  %v798_v2 = vpop.permute.xlu0 %797 }
 0x1a4   : > { %1062 = vrcp.f32 %v703_v31 }
 0x1a8   : > { %v1059_v40 = vpop.eup %1058 }
 0x1a9   : > { %v1061_v41 = vpop.eup %1060  ;;  %v1354_v10 = vmul.f32 %v1059_v40, %v689_v25 }
 0x1aa   : > { %v1063_v42 = vpop.eup %1062  ;;  %v1356_v43 = vmul.f32 %v1061_v41, %v690_v27 }
 0x1ab   : > { %v1358_v1 = vmul.f32 %v1063_v42, %v691_v28  ;;  %v722_v44 = vperm.slane %v1354_v10, 0  ;;  %v748_v11 = vperm.slane %v1354_v10, 2  ;;  %v735_v45 = vperm.slane %v1354_v10, 1 }
 0x1ac   : > { %v723_v48 = vperm.slane %v1356_v43, 0  ;;  %v736_v49 = vperm.slane %v1356_v43, 1  ;;  %v749_v52 = vperm.slane %v1356_v43, 2  ;;  %v761_v37 = vperm.slane %v1354_v10, 3  ;;  %v772_v60 = vpop.permute.xlu1 %771 }
 0x1ad   : > { %v724_v50 = vperm.slane %v1358_v1, 0  ;;  %v725_v51 = vmul.f32 %v722_v44, %v720_v35  ;;  %v750_v55 = vperm.slane %v1358_v1, 2  ;;  %v737_v56 = vperm.slane %v1358_v1, 1 }
 0x1ae   : > { %v726_v54 = vmul.f32 %v723_v48, %v720_v35  ;;  %v751_v47 = vmul.f32 %v748_v11, %v746_v39  ;;  %v738_v59 = vmul.f32 %v735_v45, %v733_v53  ;;  %v739_v62 = vmul.f32 %v736_v49, %v733_v53 }
 0x1af   : > { %v727_v57 = vmul.f32 %v724_v50, %v720_v35  ;;  %v728_v58 = vadd.f32 %v725_v51, %v715_v38  ;;  %v763_v63 = vperm.slane %v1358_v1, 3  ;;  %v762_v0 = vperm.slane %v1356_v43, 3 }
 0x1b0   : > { %v729_v61 = vadd.f32 %v726_v54, %v715_v38  ;;  %v740_v6 = vmul.f32 %v737_v56, %v733_v53  ;;  %v774_v8 = vperm.slane %v1354_v10, 4  ;;  %v752_v9 = vmul.f32 %v749_v52, %v746_v39 }
 0x1b1   : > { %v730_v4 = vadd.f32 %v727_v57, %v715_v38  ;;  %v741_v7 = vadd.f32 %v738_v59, %v728_v58  ;;  %v753_v12 = vmul.f32 %v750_v55, %v746_v39  ;;  %v775_v14 = vperm.slane %v1356_v43, 4 }
 0x1b2   : > { %v742_v13 = vadd.f32 %v739_v62, %v729_v61  ;;  %v764_v17 = vmul.f32 %v761_v37, %v759_v46  ;;  %v776_v18 = vperm.slane %v1358_v1, 4  ;;  %v765_v23 = vmul.f32 %v762_v0, %v759_v46 }
 0x1b3   : > { %v743_v15 = vadd.f32 %v740_v6, %v730_v4  ;;  %v754_v16 = vadd.f32 %v751_v47, %v741_v7  ;;  %v766_v21 = vmul.f32 %v763_v63, %v759_v46  ;;  %v777_v24 = vmul.f32 %v774_v8, %v772_v60 }
 0x1b4   : > { %v755_v22 = vadd.f32 %v752_v9, %v742_v13  ;;  %v778_v27 = vmul.f32 %v775_v14, %v772_v60  ;;  %v800_v28 = vperm.slane %v1354_v10, 6  ;;  %v779_v19 = vmul.f32 %v776_v18, %v772_v60 }
 0x1b5   : > { %v756_v25 = vadd.f32 %v753_v12, %v743_v15  ;;  %v767_v26 = vadd.f32 %v764_v17, %v754_v16  ;;  %v801_v20 = vperm.slane %v1356_v43, 6  ;;  %v787_v33 = vperm.slane %v1354_v10, 5  ;;  %v811_v40 = vpop.permute.xlu1 %810 }
 0x1b6   : > { %v768_v32 = vadd.f32 %v765_v23, %v755_v22  ;;  %v802_v3 = vperm.slane %v1358_v1, 6  ;;  %v789_v5 = vperm.slane %v1358_v1, 5  ;;  %v788_v30 = vperm.slane %v1356_v43, 5 }
 0x1b7   : > { %v769_v34 = vadd.f32 %v766_v21, %v756_v25  ;;  %v780_v35 = vadd.f32 %v777_v24, %v767_v26  ;;  %v790_v31 = vmul.f32 %v787_v33, %v785_v29  ;;  %v803_v41 = vmul.f32 %v800_v28, %v798_v2 }
 0x1b8   : > { %v781_v36 = vadd.f32 %v778_v27, %v768_v32  ;;  %v792_v39 = vmul.f32 %v789_v5, %v785_v29  ;;  %v791_v42 = vmul.f32 %v788_v30, %v785_v29  ;;  %v813_v11 = vperm.slane %v1354_v10, 7 }
 0x1b9   : > { %v782_v38 = vadd.f32 %v779_v19, %v769_v34  ;;  %v793_v44 = vadd.f32 %v790_v31, %v780_v35  ;;  %v804_v45 = vmul.f32 %v801_v20, %v798_v2  ;;  %v805_v46 = vmul.f32 %v802_v3, %v798_v2 }
 0x1ba   : > { %v815_v49 = vperm.slane %v1358_v1, 7  ;;  %v794_v50 = vadd.f32 %v791_v42, %v781_v36  ;;  %v814_v52 = vperm.slane %v1356_v43, 7  ;;  %v816_v53 = vmul.f32 %v813_v11, %v811_v40 }
 0x1bb   : > { %v795_v48 = vadd.f32 %v792_v39, %v782_v38  ;;  %v806_v51 = vadd.f32 %v803_v41, %v793_v44 }
 0x1bc   : > { %v818_v55 = vmul.f32 %v815_v49, %v811_v40  ;;  %v807_v56 = vadd.f32 %v804_v45, %v794_v50  ;;  %v817_v37 = vmul.f32 %v814_v52, %v811_v40 }
 0x1bd   : > { %v808_v54 = vadd.f32 %v805_v46, %v795_v48  ;;  %v819_v57 = vadd.f32 %v816_v53, %v806_v51 }
 0x1be   : > { %v820_v47 = vadd.f32 %v817_v37, %v807_v56 }
 0x1bf   : > { %v821_v58 = vadd.f32 %v818_v55, %v808_v54  ;;  %v822_v59 = vsub.f32 0.0, %v819_v57 }
 0x1c0   : > { %v823_v10 = vsub.f32 0.0, %v820_v47 }
 0x1c1   : > { %v824_v60 = vsub.f32 0.0, %v821_v58  ;;  %v825_v61 = vmul.f32 1.442695, %v822_v59 }
 0x1c2   : > { %v827_v63 = vmul.f32 1.442695, %v823_v10 }
 0x1c3   : > { %v829_v62 = vmul.f32 1.442695, %v824_v60  ;;  %1064 = vpow2.f32 %v825_v61 }
 0x1c5   : > { %1066 = vpow2.f32 %v829_v62 }
 0x1c6   : > { %1068 = vpow2.f32 %v827_v63 }
 0x1c9   : > { %v1065_v1 = vpop.eup %1064 }
 0x1ca   : > { %v831_v43 = vadd.f32 1.0, %v1065_v1 }
 0x1cb   : > { %v1067_v0 = vpop.eup %1066 }
 0x1cc   : > { %v1069_v4 = vpop.eup %1068  ;;  %v833_v6 = vadd.f32 1.0, %v1067_v0  ;;  %1070 = vrcp.f32 %v831_v43 }
 0x1cd   : > { %v832_v7 = vadd.f32 1.0, %v1069_v4 }
 0x1ce   : > { %1072 = vrcp.f32 %v833_v6 }
 0x1cf   : > { %1074 = vrcp.f32 %v832_v7 }
 0x1d2   : > { %v1071_v8 = vpop.eup %1070 }
 0x1d3   : > { %v837_v12 = vmul.f32 %v1071_v8, %v819_v57 }
 0x1d4   : > { %v1073_v9 = vpop.eup %1072 }
 0x1d5   : > { %v1075_v13 = vpop.eup %1074  ;;  %v839_v14 = vmul.f32 %v1073_v9, %v821_v58 }
 0x1d6   : > { %v838_v15 = vmul.f32 %v1075_v13, %v820_v47 }
 0x1d7   : > { %v841_v16 = vpack.c.bf16 %v839_v14, %v839_v14 }
 0x1d8   : > { %v840_v17 = vpack.c.bf16 %v838_v15, %v837_v12 }
 0x1d9   : > { %v845_v18 = vrot.slane %v841_v16, 4  ;;  %v846_v22 = vrot.slane %v841_v16, 6 }
 0x1da   : > { %v844_v23 = vrot.slane %v840_v17, 2 }
 0x1db   : > { %v854_v21 = vsel %vm851_vm0, %v845_v18, %v846_v22 }
 0x1dc   : > { %v850_v24 = vsel %vm847_vm1, %v840_v17, %v844_v23 }
 0x1dd   : > { %v856_v25 = vsel %vm855_vm2, %v850_v24, %v854_v21 }
 0x1de   : > { %858 = vrot.lane.b32.xlu2 %v856_v25, %s1154_s16  ;;  %s1090_s16 = sshra.s32 %s882_s23, 4  ;;  %s1091_s16 = int_to_ptr.hbm [resolvable:$true] %s1090_s16 }
 0x1df   : > { %s1092_s8 = scalar_lea.hbm %s1091_s16, 4  ;;  %p1097_p0 = scmp.lt.s32.totalorder %s1091_s16, %s1425_s7 }
 0x1e0   : > { %p1093_p11 = scmp.ne.s32.totalorder %s1091_s16, %s1092_s8  ;;  %p1098_p1 = scmp.lt.s32.totalorder %s1096_s13, %s1092_s8 }
 0x1e2   : > { %p1094_p12 = pnand %p1093_p11, %p1240_p5  ;;  %p1099_p2 = por %p1098_p1, %p1097_p0 }
 0x1e4   : > { %p1095_p13 = pneg %p1094_p12 }
 0x1e6   : > { %p1100_p3 = pnand %p1099_p2, %p1095_p13 }
 0x238   : > { %v859_v26 = vpop.permute.xlu2 %858 }
 0x239   : > { %v860_v27 = vrot.slane %v859_v26, 2 }
 0x23b   : > { %v862_v28 = vsel %vm666_vm8, %v859_v26, %v860_v27 }
 0x23c   : > { %864 = vst [vmem:[%s271_s21] sm:$0xf] %v862_v28 }
 0x23d   : > { %1103 = shalt.err (!%p1100_p3)
}
 0x23e   : > { %959 = dma.vmem_to_hbm [thread:$0]  (%p1240_p5), %s880_s22, 64, %s882_s23, %s866_s29  }
 0x23f PF: > { %p965_p4 = scmp.ge.s32.totalorder %s1138_s27, 2  ;;  %s893_s14 = sand.u32 1, %s1126_s24  }
 0x240   : > { %s894_s18 = scalar_lea.sflag [#allocation4], %s893_s14 }
 0x241   : > { %p962_p7 = pnand %p965_p4, %p1244_p6 }
 0x243   : > { %p963_p8 = pneg %p962_p7 }
 0x245   : > { %1121 = dma.done.wait (%p963_p8), %s894_s18, 64  }
 0x246   : > { %1123 = vsyncadd (%p963_p8), %s894_s18, 4294967232  ;;  %p17_p9 = scmp.ge.s32.totalorder %s1227_s30, 4   ;;  %s1428_s24 = smov %s1130_s25 }
 0x247   : > { %s1429_s25 = smov %s1134_s26  ;;  %s1430_s26 = smov %s1238_s10 }
 0x248   : > { %s1431_s27 = smov %s1227_s30  ;;  %19 = sbr.rel (!%p17_p9) target bundleno = 3 (0x3), region = 83 }
 0x24d   :  { %900 = vsyncpa [#allocation4], 1 }
 0x24e   :  { %902 = vsyncpa [#allocation4 + $0x1], 1 }

</bundles_post_ra>
